<compile_context>
chip_gen: v7x
topology: tpu7x:2x2x1
jax: 0.10.0
libtpu: 0.0.40
codegen_flags: <defaults>
</compile_context>

<pallas_src>
import math

import jax
import jax.numpy as jnp
from jax import lax
from jax.experimental import pallas as pl
from jax.experimental.pallas import tpu as pltpu

LANES = 128
SUBLANES = 8


def _make_dice_sums_kernel(row_tile, rows, steps_per_split, has_weights, sub,
                           need_mask):
    """Builds the kernel for a fixed (static) tiling configuration."""

    def kernel(*refs):
        if has_weights:
            pred_ref, gt_ref, mask_ref, w_ref, out_ref = refs
        else:
            pred_ref, gt_ref, mask_ref, out_ref = refs
            w_ref = None

        c = pl.program_id(0)   # core / split axis ("parallel")
        i = pl.program_id(1)   # reduction sweep axis ("arbitrary")

        # Output block is resident across the reduction axis -> it IS the
        # accumulator.  Each split `c` owns its own output block.
        @pl.when(i == 0)
        def _init():
            out_ref[...] = jnp.zeros_like(out_ref)

        # Upcast on the VPU after load; inputs stay narrow in HBM.
        p = pred_ref[...].astype(jnp.float32)
        g = gt_ref[...].astype(jnp.float32)
        m = mask_ref[...].astype(jnp.float32)
        if has_weights:
            m = m * w_ref[...].astype(jnp.float32)

        pm = p * m
        gm = g * m
        pgm = pm * g

        if need_mask:
            # Either the last block is partial (garbage rows past `rows`) or
            # this split has a duplicated/clamped out-of-range block.  Select
            # AFTER the multiplies (NaN-safe: garbage*0 could be NaN/Inf).
            b = c * steps_per_split + i
            row_idx = lax.broadcasted_iota(jnp.int32, (row_tile, LANES), 0)
            valid = (b * row_tile + row_idx) < rows
            zero = jnp.zeros_like(pm)
            pm = jnp.where(valid, pm, zero)
            gm = jnp.where(valid, gm, zero)
            pgm = jnp.where(valid, pgm, zero)

        def fold(x):
            # (row_tile, LANES) -> (sub, LANES) via leading-axis reductions:
            # plain per-vreg VPU adds, no XLU work per step.
            if sub == SUBLANES:
                return jnp.sum(
                    x.reshape(row_tile // SUBLANES, SUBLANES, LANES), axis=0)
            return jnp.sum(x, axis=0, keepdims=True)

        out_ref[0] += fold(pgm)   # sum(pred * gt * mask)
        out_ref[1] += fold(pm)    # sum(pred * mask)
        out_ref[2] += fold(gm)    # sum(gt  * mask)

    return kernel


def dice_loss(pred, gt, mask, weights=None, eps=1e-6, row_tile=4096,
              num_core_splits=2):
    """Dice loss. Callers should pass gt/mask/weights in their narrowest native
    dtype (bf16/int8/bool are fine); the kernel upcasts on-chip."""
    assert pred.shape == gt.shape
    assert pred.shape == mask.shape
    has_weights = weights is not None
    if has_weights:
        assert weights.shape == mask.shape

    operands = [pred, gt, mask] + ([weights] if has_weights else [])
    n = int(math.prod(pred.shape))

    flat = [jnp.reshape(x, (-1,)) for x in operands]
    n_aligned = (n // LANES) * LANES
    rows = n_aligned // LANES

    sums = jnp.zeros((3,), jnp.float32)

    if rows > 0:
        if n_aligned == n:
            mats = [x.reshape(rows, LANES) for x in flat]
        else:
            mats = [x[:n_aligned].reshape(rows, LANES) for x in flat]

        # --- tile-size selection -------------------------------------------
        itemsize_sum = sum(int(jnp.dtype(m.dtype).itemsize) for m in mats)
        # Keep double-buffered input VMEM <= ~16 MiB (fits v5e/v6e/v7x once the
        # limit is raised explicitly below).
        rt_cap = max(32, (16 << 20) // (2 * LANES * itemsize_sum))
        rt = min(int(row_tile), int(rt_cap), rows)
        if rt < rows:
            rt = (rt // 32) * 32          # multiple of 32: narrow-dtype packing
            if rt == 0:
                rt = rows                 # tiny arrays: single full block
        sub = SUBLANES if rt % SUBLANES == 0 else 1

        total_blocks = pl.cdiv(rows, rt)
        num_splits = max(1, min(int(num_core_splits), total_blocks))
        steps = pl.cdiv(total_blocks, num_splits)
        even_split = (num_splits * steps == total_blocks)
        need_mask = (rows % rt != 0) or (not even_split)

        if even_split:
            def in_map(c, i):
                return (c * steps + i, 0)
        else:
            def in_map(c, i):
                # Clamp out-of-range blocks of the last split; their
                # contribution is zeroed by the in-kernel mask.
                return (jnp.minimum(c * steps + i, total_blocks - 1), 0)

        in_spec = pl.BlockSpec((rt, LANES), in_map)
        out_spec = pl.BlockSpec((3, sub, LANES), lambda c, i: (c, 0, 0))

        kernel = _make_dice_sums_kernel(rt, rows, steps, has_weights, sub,
                                        need_mask)

        in_bytes = sum(int(m.size) * int(jnp.dtype(m.dtype).itemsize)
                       for m in mats)
        out_bytes = num_splits * 3 * sub * LANES * 4
        per_elem_flops = 7 if has_weights else 6
        cost = pl.CostEstimate(
            flops=per_elem_flops * rows * LANES,
            transcendentals=0,
            bytes_accessed=in_bytes + out_bytes,
        )

        buffered_in_bytes = 2 * rt * LANES * itemsize_sum
        vmem_limit = int(min(buffered_in_bytes + (8 << 20), 40 << 20))

        partials = pl.pallas_call(
            kernel,
            out_shape=jax.ShapeDtypeStruct((num_splits * 3, sub, LANES),
                                           jnp.float32),
            grid_spec=pltpu.PrefetchScalarGridSpec(
                num_scalar_prefetch=0,
                grid=(num_splits, steps),
                in_specs=[in_spec] * len(mats),
                out_specs=out_spec,
            ),
            compiler_params=pltpu.CompilerParams(
                dimension_semantics=("parallel", "arbitrary"),
                vmem_limit_bytes=vmem_limit,
            ),
            cost_estimate=cost,
        )(*mats)

        sums = jnp.sum(partials.reshape(num_splits, 3, sub, LANES),
                       axis=(0, 2, 3))

    if n_aligned < n:
        # <128-element tail: tiny wrapper-side sums (no full-array pad copy).
        tails = [x[n_aligned:].astype(jnp.float32) for x in flat]
        if has_weights:
            pt, gtl, mt, wt = tails
            mt = mt * wt
        else:
            pt, gtl, mt = tails
        tail_sums = jnp.stack([jnp.sum(pt * gtl * mt),
                               jnp.sum(pt * mt),
                               jnp.sum(gtl * mt)])
        sums = sums + tail_sums

    intersection = sums[0]
    union = sums[1] + sums[2] + jnp.float32(eps)
    return 1.0 - 2.0 * intersection / union


if __name__ == "__main__":
    key = jax.random.PRNGKey(0)
    k1, k2, k3, k4 = jax.random.split(key, 4)

    def ref_loss(pred, gt, mask, weights=None, eps=1e-6):
        m = mask if weights is None else weights * mask
        inter = jnp.sum(pred * gt * m)
        union = jnp.sum(pred * m) + jnp.sum(gt * m) + eps
        return 1.0 - 2.0 * inter / union

    # Case 1: main shape, weighted (fused weights path, single block).
    B, C, H, W = 2, 4, 16, 16
    pred = jax.random.uniform(k1, (B, C, H, W), dtype=jnp.float32)
    gt = (jax.random.uniform(k2, (B, C, H, W)) > 0.5).astype(jnp.float32)
    mask = (jax.random.uniform(k3, (B, C, H, W)) > 0.2).astype(jnp.float32)
    weights = jax.random.uniform(k4, (B, C, H, W), dtype=jnp.float32)

    loss = jax.block_until_ready(dice_loss(pred, gt, mask, weights=weights))
    loss_ref = ref_loss(pred, gt, mask, weights)
    assert float(loss) <= 1.0  # mirrors the torch `assert loss <= 1`
    assert abs(float(loss) - float(loss_ref)) < 3e-5, (float(loss), float(loss_ref))

    # Case 2: unweighted, small row_tile -> multi-block sweep with a partial
    # last block AND an uneven 2-way split (clamped duplicate block is masked).
    # rows=80, rt=32 -> 3 blocks over 2 splits.
    shape2 = (2, 5, 32, 32)
    p2 = jax.random.uniform(k1, shape2, dtype=jnp.float32)
    g2 = (jax.random.uniform(k2, shape2) > 0.5).astype(jnp.float32)
    m2 = (jax.random.uniform(k3, shape2) > 0.2).astype(jnp.float32)
    l2 = jax.block_until_ready(dice_loss(p2, g2, m2, row_tile=32))
    l2_ref = ref_loss(p2, g2, m2)
    assert abs(float(l2) - float(l2_ref)) < 3e-5, (float(l2), float(l2_ref))

    # Case 3: numel not a multiple of 128 -> kernel sweeps the aligned prefix
    # (rows=18, sub=1 fold path) and the 96-element tail is summed in-wrapper.
    shape3 = (2, 3, 20, 20)
    p3 = jax.random.uniform(k2, shape3, dtype=jnp.float32)
    g3 = (jax.random.uniform(k3, shape3) > 0.5).astype(jnp.float32)
    m3 = (jax.random.uniform(k4, shape3) > 0.2).astype(jnp.float32)
    w3 = jax.random.uniform(k1, shape3, dtype=jnp.float32)
    l3 = jax.block_until_ready(dice_loss(p3, g3, m3, weights=w3))
    l3_ref = ref_loss(p3, g3, m3, w3)
    assert abs(float(l3) - float(l3_ref)) < 3e-5, (float(l3), float(l3_ref))

    # Case 4: narrow-dtype input (bf16 pred) stays narrow in HBM and is upcast
    # on the VPU inside the kernel.
    p4 = pred.astype(jnp.bfloat16)
    l4 = jax.block_until_ready(dice_loss(p4, gt, mask, weights=weights))
    l4_ref = ref_loss(p4.astype(jnp.float32), gt, mask, weights)
    assert abs(float(l4) - float(l4_ref)) < 3e-4, (float(l4), float(l4_ref))

    print("KERNEL_OK")
</pallas_src>

<mosaic_0001>
module attributes {stable_mosaic.version = 11 : i64} {
  func.func @kernel(%arg0: i32, %arg1: i32, %arg2: memref<16x128xf32, #tpu.memory_space<vmem>>, %arg3: memref<16x128xf32, #tpu.memory_space<vmem>>, %arg4: memref<16x128xf32, #tpu.memory_space<vmem>>, %arg5: memref<16x128xf32, #tpu.memory_space<vmem>>, %arg6: memref<3x8x128xf32, #tpu.memory_space<vmem>>) attributes {dimension_semantics = [#tpu.dimension_semantics<parallel>, #tpu.dimension_semantics<arbitrary>], iteration_bounds = array<i64: 1, 1>, scalar_prefetch = 0 : i64, scratch_operands = 0 : i64, tpu.core_type = #tpu.core_type<tc>, window_params = [{transform_indices = @transform_0, window_bounds = array<i64: 16, 128>}, {transform_indices = @transform_1, window_bounds = array<i64: 16, 128>}, {transform_indices = @transform_2, window_bounds = array<i64: 16, 128>}, {transform_indices = @transform_3, window_bounds = array<i64: 16, 128>}, {transform_indices = @transform_4, window_bounds = array<i64: 3, 8, 128>}]} {
    %c0_i32 = arith.constant 0 : i32
    %0 = arith.cmpi eq, %arg1, %c0_i32 : i32
    %1 = arith.extui %0 : i1 to i32
    %c0_i32_0 = arith.constant 0 : i32
    %2 = arith.cmpi ne, %1, %c0_i32_0 : i32
    scf.if %2 {
      %cst_26 = arith.constant 0.000000e+00 : f32
      %35 = vector.broadcast %cst_26 : f32 to vector<3x8x128xf32>
      %c0_27 = arith.constant 0 : index
      %c0_28 = arith.constant 0 : index
      %c0_29 = arith.constant 0 : index
      %36 = vector.load %arg6[%c0_27, %c0_28, %c0_29] : memref<3x8x128xf32, #tpu.memory_space<vmem>>, vector<3x8x128xf32>
      tpu.vector_store %arg6[%c0_27, %c0_28, %c0_29], %35 {strides = array<i32>} : memref<3x8x128xf32, #tpu.memory_space<vmem>>, vector<3x8x128xf32>,
    } else {
    }
    %c0 = arith.constant 0 : index
    %c0_1 = arith.constant 0 : index
    %3 = vector.load %arg2[%c0, %c0_1] : memref<16x128xf32, #tpu.memory_space<vmem>>, vector<16x128xf32>
    %c0_2 = arith.constant 0 : index
    %c0_3 = arith.constant 0 : index
    %4 = vector.load %arg3[%c0_2, %c0_3] : memref<16x128xf32, #tpu.memory_space<vmem>>, vector<16x128xf32>
    %c0_4 = arith.constant 0 : index
    %c0_5 = arith.constant 0 : index
    %5 = vector.load %arg4[%c0_4, %c0_5] : memref<16x128xf32, #tpu.memory_space<vmem>>, vector<16x128xf32>
    %c0_6 = arith.constant 0 : index
    %c0_7 = arith.constant 0 : index
    %6 = vector.load %arg5[%c0_6, %c0_7] : memref<16x128xf32, #tpu.memory_space<vmem>>, vector<16x128xf32>
    %7 = arith.mulf %5, %6 : vector<16x128xf32>
    %8 = arith.mulf %3, %7 : vector<16x128xf32>
    %9 = arith.mulf %4, %7 : vector<16x128xf32>
    %10 = arith.mulf %8, %4 : vector<16x128xf32>
    %c0_8 = arith.constant 0 : index
    %c0_9 = arith.constant 0 : index
    %c0_10 = arith.constant 0 : index
    %11 = vector.load %arg6[%c0_8, %c0_9, %c0_10] : memref<3x8x128xf32, #tpu.memory_space<vmem>>, vector<1x8x128xf32>
    %12 = vector.shape_cast %11 : vector<1x8x128xf32> to vector<8x128xf32>
    %13 = vector.shape_cast %10 : vector<16x128xf32> to vector<2x8x128xf32>
    %cst = arith.constant dense<0.000000e+00> : vector<8x128xf32>
    %14 = vector.multi_reduction <add>, %13, %cst [0] : vector<2x8x128xf32> to vector<8x128xf32>
    %15 = arith.addf %12, %14 : vector<8x128xf32>
    %c0_11 = arith.constant 0 : index
    %c0_12 = arith.constant 0 : index
    %c0_13 = arith.constant 0 : index
    %16 = vector.load %arg6[%c0_11, %c0_12, %c0_13] : memref<3x8x128xf32, #tpu.memory_space<vmem>>, vector<1x8x128xf32>
    %17 = vector.shape_cast %16 : vector<1x8x128xf32> to vector<8x128xf32>
    %18 = vector.shape_cast %15 : vector<8x128xf32> to vector<1x8x128xf32>
    tpu.vector_store %arg6[%c0_11, %c0_12, %c0_13], %18 {strides = array<i32>} : memref<3x8x128xf32, #tpu.memory_space<vmem>>, vector<1x8x128xf32>,
    %c1 = arith.constant 1 : index
    %c0_14 = arith.constant 0 : index
    %c0_15 = arith.constant 0 : index
    %19 = vector.load %arg6[%c1, %c0_14, %c0_15] : memref<3x8x128xf32, #tpu.memory_space<vmem>>, vector<1x8x128xf32>
    %20 = vector.shape_cast %19 : vector<1x8x128xf32> to vector<8x128xf32>
    %21 = vector.shape_cast %8 : vector<16x128xf32> to vector<2x8x128xf32>
    %cst_16 = arith.constant dense<0.000000e+00> : vector<8x128xf32>
    %22 = vector.multi_reduction <add>, %21, %cst_16 [0] : vector<2x8x128xf32> to vector<8x128xf32>
    %23 = arith.addf %20, %22 : vector<8x128xf32>
    %c1_17 = arith.constant 1 : index
    %c0_18 = arith.constant 0 : index
    %c0_19 = arith.constant 0 : index
    %24 = vector.load %arg6[%c1_17, %c0_18, %c0_19] : memref<3x8x128xf32, #tpu.memory_space<vmem>>, vector<1x8x128xf32>
    %25 = vector.shape_cast %24 : vector<1x8x128xf32> to vector<8x128xf32>
    %26 = vector.shape_cast %23 : vector<8x128xf32> to vector<1x8x128xf32>
    tpu.vector_store %arg6[%c1_17, %c0_18, %c0_19], %26 {strides = array<i32>} : memref<3x8x128xf32, #tpu.memory_space<vmem>>, vector<1x8x128xf32>,
    %c2 = arith.constant 2 : index
    %c0_20 = arith.constant 0 : index
    %c0_21 = arith.constant 0 : index
    %27 = vector.load %arg6[%c2, %c0_20, %c0_21] : memref<3x8x128xf32, #tpu.memory_space<vmem>>, vector<1x8x128xf32>
    %28 = vector.shape_cast %27 : vector<1x8x128xf32> to vector<8x128xf32>
    %29 = vector.shape_cast %9 : vector<16x128xf32> to vector<2x8x128xf32>
    %cst_22 = arith.constant dense<0.000000e+00> : vector<8x128xf32>
    %30 = vector.multi_reduction <add>, %29, %cst_22 [0] : vector<2x8x128xf32> to vector<8x128xf32>
    %31 = arith.addf %28, %30 : vector<8x128xf32>
    %c2_23 = arith.constant 2 : index
    %c0_24 = arith.constant 0 : index
    %c0_25 = arith.constant 0 : index
    %32 = vector.load %arg6[%c2_23, %c0_24, %c0_25] : memref<3x8x128xf32, #tpu.memory_space<vmem>>, vector<1x8x128xf32>
    %33 = vector.shape_cast %32 : vector<1x8x128xf32> to vector<8x128xf32>
    %34 = vector.shape_cast %31 : vector<8x128xf32> to vector<1x8x128xf32>
    tpu.vector_store %arg6[%c2_23, %c0_24, %c0_25], %34 {strides = array<i32>} : memref<3x8x128xf32, #tpu.memory_space<vmem>>, vector<1x8x128xf32>,
    return
  }
  func.func @transform_0(%arg0: i32, %arg1: i32) -> (i32, i32) {
    %c1_i32 = arith.constant 1 : i32
    %0 = arith.muli %arg0, %c1_i32 : i32
    %1 = arith.addi %0, %arg1 : i32
    %c0_i32 = arith.constant 0 : i32
    %c0_i32_0 = arith.constant 0 : i32
    return %1, %c0_i32 : i32, i32
  }
  func.func @transform_1(%arg0: i32, %arg1: i32) -> (i32, i32) {
    %c1_i32 = arith.constant 1 : i32
    %0 = arith.muli %arg0, %c1_i32 : i32
    %1 = arith.addi %0, %arg1 : i32
    %c0_i32 = arith.constant 0 : i32
    %c0_i32_0 = arith.constant 0 : i32
    return %1, %c0_i32 : i32, i32
  }
  func.func @transform_2(%arg0: i32, %arg1: i32) -> (i32, i32) {
    %c1_i32 = arith.constant 1 : i32
    %0 = arith.muli %arg0, %c1_i32 : i32
    %1 = arith.addi %0, %arg1 : i32
    %c0_i32 = arith.constant 0 : i32
    %c0_i32_0 = arith.constant 0 : i32
    return %1, %c0_i32 : i32, i32
  }
  func.func @transform_3(%arg0: i32, %arg1: i32) -> (i32, i32) {
    %c1_i32 = arith.constant 1 : i32
    %0 = arith.muli %arg0, %c1_i32 : i32
    %1 = arith.addi %0, %arg1 : i32
    %c0_i32 = arith.constant 0 : i32
    %c0_i32_0 = arith.constant 0 : i32
    return %1, %c0_i32 : i32, i32
  }
  func.func @transform_4(%arg0: i32, %arg1: i32) -> (i32, i32, i32) {
    %c0_i32 = arith.constant 0 : i32
    %c0_i32_0 = arith.constant 0 : i32
    %c0_i32_1 = arith.constant 0 : i32
    return %arg0, %c0_i32, %c0_i32_0 : i32, i32, i32
  }
}

</mosaic_0001>

<bundles_post_ra>
// kernel: tpu_custom_call.1
= control target key start
LH: loop header
LB: loop body
LE: loop exit
PB: predicated region body
PF: predicated region fallthrough
CT: control target
= control target key end

     0   :  { %9 = vsyncpa [#allocation3], 0  ;;  %s400_s0 = inlined_call_operand.hbm [shape: f32[16,128], index: 0, kind: input, shape index: {}]   ;;  %s401_s1 = inlined_call_operand.hbm [shape: f32[16,128], index: 1, kind: input, shape index: {}]   ;;  %s402_s2 = inlined_call_operand.hbm [shape: f32[16,128], index: 2, kind: input, shape index: {}]   ;;  %s403_s3 = inlined_call_operand.hbm [shape: f32[16,128], index: 3, kind: input, shape index: {}]   ;;  %s404_s4 = inlined_call_operand.hbm [shape: f32[3,8,128], index: 4, kind: output, shape index: {}]  }
   0x1   :  { %10 = vsyncpa [#allocation6], 0 }
   0x2   :  { %11 = vsyncpa [#allocation9], 0 }
   0x3   :  { %12 = vsyncpa [#allocation4], 0  ;;  %s279_s15 = smov [#allocation5]   ;;  %s280_s17 = smov [#allocation2]  }
   0x4   :  { %s38_s16 = sshll.u32 %s279_s15, 4  ;;  %s22_s18 = sshll.u32 %s280_s17, 4  ;;  %s39_s16 = int_to_ptr.vmem [resolvable:$true] %s38_s16  ;;  %s311_s18 = int_to_ptr.vmem [resolvable:$true] %s22_s18 }
   0x5   :  { %s161_s21 = scalar_lea.hbm %s401_s1, 256 }
   0x6   :  { %p162_p0 = scmp.ne.s32.totalorder %s401_s1, %s161_s21  ;;  %p165_p1 = scmp.lt.u32.totalorder %s161_s21, %s401_s1 }
   0x8   :  { %p167_p2 = pnand %p165_p1, %p162_p0 }
   0xa   :  { %170 = shalt.err (!%p167_p2)
}
   0xb   :  { %s171_s26 = scalar_lea.vmem %s39_s16, 256  ;;  %p176_p4 = scmp.lt.s32.totalorder %s39_s16, %s39_s16 }
   0xc   :  { %p172_p3 = scmp.ne.s32.totalorder %s39_s16, %s171_s26  ;;  %p177_p5 = scmp.lt.s32.totalorder %s171_s26, %s171_s26 }
   0xe   :  { %p178_p6 = por %p177_p5, %p176_p4 }
  0x10   :  { %p179_p7 = pnand %p178_p6, %p172_p3 }
  0x12   :  { %182 = shalt.err (!%p179_p7)
}
  0x13   :  { %s281_s27 = smov 128   ;;  %s282_s28 = smov 8  }
  0x14   :  { %44 = dma.hbm_to_vmem [thread:$0]  %s401_s1, 256, %s39_s16, [#allocation6], %s281_s27, %s281_s27, %s282_s28  }
  0x15   :  { %s183_s7 = scalar_lea.hbm %s400_s0, 256 }
  0x16   :  { %p184_p8 = scmp.ne.s32.totalorder %s400_s0, %s183_s7  ;;  %p187_p9 = scmp.lt.u32.totalorder %s183_s7, %s400_s0 }
  0x18   :  { %p189_p10 = pnand %p187_p9, %p184_p8 }
  0x1a   :  { %192 = shalt.err (!%p189_p10)
}
  0x1b   :  { %s193_s12 = scalar_lea.vmem %s311_s18, 256  ;;  %p198_p12 = scmp.lt.s32.totalorder %s311_s18, %s311_s18 }
  0x1c   :  { %p194_p11 = scmp.ne.s32.totalorder %s311_s18, %s193_s12  ;;  %p199_p13 = scmp.lt.s32.totalorder %s193_s12, %s193_s12 }
  0x1e   :  { %p200_p0 = por %p199_p13, %p198_p12 }
  0x20   :  { %p201_p1 = pnand %p200_p0, %p194_p11 }
  0x22   :  { %204 = shalt.err (!%p201_p1)
}
  0x23   :  { %28 = dma.hbm_to_vmem [thread:$0]  %s400_s0, 256, %s311_s18, [#allocation3], %s281_s27, %s281_s27, %s282_s28  }
  0x24   :  { %s283_s14 = smov [#allocation7]   ;;  %s284_s16 = smov [#allocation8]  }
  0x25   :  { %s54_s15 = sshll.u32 %s283_s14, 4  ;;  %s70_s17 = sshll.u32 %s284_s16, 4  ;;  %s55_s15 = int_to_ptr.vmem [resolvable:$true] %s54_s15  ;;  %s348_s17 = int_to_ptr.vmem [resolvable:$true] %s70_s17 }
  0x26   :  { %s205_s21 = scalar_lea.hbm %s402_s2, 256 }
  0x27   :  { %p206_p2 = scmp.ne.s32.totalorder %s402_s2, %s205_s21  ;;  %p209_p3 = scmp.lt.u32.totalorder %s205_s21, %s402_s2 }
  0x29   :  { %p211_p4 = pnand %p209_p3, %p206_p2 }
  0x2b   :  { %214 = shalt.err (!%p211_p4)
}
  0x2c   :  { %s215_s0 = scalar_lea.vmem %s55_s15, 256  ;;  %p220_p6 = scmp.lt.s32.totalorder %s55_s15, %s55_s15 }
  0x2d   :  { %p216_p5 = scmp.ne.s32.totalorder %s55_s15, %s215_s0  ;;  %p221_p7 = scmp.lt.s32.totalorder %s215_s0, %s215_s0 }
  0x2f   :  { %p222_p8 = por %p221_p7, %p220_p6 }
  0x31   :  { %p223_p9 = pnand %p222_p8, %p216_p5 }
  0x33   :  { %226 = shalt.err (!%p223_p9)
}
  0x34   :  { %60 = dma.hbm_to_vmem [thread:$0]  %s402_s2, 256, %s55_s15, [#allocation6], %s281_s27, %s281_s27, %s282_s28  }
  0x35   :  { %s227_s5 = scalar_lea.hbm %s403_s3, 256 }
  0x36   :  { %p228_p10 = scmp.ne.s32.totalorder %s403_s3, %s227_s5  ;;  %p231_p11 = scmp.lt.u32.totalorder %s227_s5, %s403_s3 }
  0x38   :  { %p233_p12 = pnand %p231_p11, %p228_p10 }
  0x3a   :  { %236 = shalt.err (!%p233_p12)
}
  0x3b   :  { %s237_s10 = scalar_lea.vmem %s348_s17, 256  ;;  %p242_p0 = scmp.lt.s32.totalorder %s348_s17, %s348_s17 }
  0x3c   :  { %p238_p13 = scmp.ne.s32.totalorder %s348_s17, %s237_s10  ;;  %p243_p1 = scmp.lt.s32.totalorder %s237_s10, %s237_s10 }
  0x3e   :  { %p244_p2 = por %p243_p1, %p242_p0 }
  0x40   :  { %p245_p3 = pnand %p244_p2, %p238_p13 }
  0x42   :  { %248 = shalt.err (!%p245_p3)
}
  0x43   :  { %76 = dma.hbm_to_vmem [thread:$0]  %s403_s3, 256, %s348_s17, [#allocation9], %s281_s27, %s281_s27, %s282_s28  }
  0x44   :  { %271 = dma.done.wait [#allocation3], 256  }
  0x45   :  { %272 = vsyncadd [#allocation3], 4294967040 }
  0x46   :  { %273 = dma.done.wait [#allocation6], 512  }
  0x47   :  { %274 = vsyncadd [#allocation6], 4294966784 }
  0x48   :  { %275 = dma.done.wait [#allocation9], 256  }
  0x49   :  { %276 = vsyncadd [#allocation9], 4294967040  ;;  %v104_v0 = vld [vmem:[#allocation2] sm:$0xff]  ;;  %v105_v1 = vld [vmem:[#allocation2 + $0x8] sm:$0xff]  ;;  %s285_s3 = smov [#allocation10]  }
  0x4a   :  { %v106_v2 = vld [vmem:[#allocation5] sm:$0xff]  ;;  %v108_v3 = vld [vmem:[#allocation7] sm:$0xff]  ;;  %v109_v4 = vld [vmem:[#allocation7 + $0x8] sm:$0xff]  ;;  %s139_s12 = sshll.u32 %s285_s3, 4  ;;  %s140_s12 = int_to_ptr.vmem [resolvable:$true] %s139_s12 }
  0x4b   :  { %v107_v5 = vld [vmem:[#allocation5 + $0x8] sm:$0xff]  ;;  %v110_v6 = vld [vmem:[#allocation8] sm:$0xff]  ;;  %s249_s1 = scalar_lea.vmem %s140_s12, 384  ;;  %p254_p5 = scmp.lt.s32.totalorder %s140_s12, %s140_s12 }
  0x4c   :  { %v111_v7 = vld [vmem:[#allocation8 + $0x8] sm:$0xff]  ;;  %v112_v8 = vmul.f32 %v110_v6, %v108_v3  ;;  %p250_p4 = scmp.ne.s32.totalorder %s140_s12, %s249_s1  ;;  %p255_p6 = scmp.lt.s32.totalorder %s249_s1, %s249_s1 }
  0x4d   :  { %v113_v9 = vmul.f32 %v111_v7, %v109_v4 }
  0x4e   :  { %v114_v10 = vmul.f32 %v112_v8, %v104_v0  ;;  %v116_v12 = vmul.f32 %v112_v8, %v106_v2  ;;  %p256_p7 = por %p255_p6, %p254_p5 }
  0x4f   :  { %v115_v11 = vmul.f32 %v113_v9, %v105_v1  ;;  %v117_v13 = vmul.f32 %v113_v9, %v107_v5 }
  0x50   :  { %v118_v14 = vmul.f32 %v114_v10, %v106_v2  ;;  %p257_p8 = pnand %p256_p7, %p250_p4 }
  0x51   :  { %v119_v15 = vmul.f32 %v115_v11, %v107_v5  ;;  %v126_v16 = vadd.f32 %v115_v11, %v114_v10  ;;  %v131_v17 = vadd.f32 %v117_v13, %v116_v12 }
  0x53   :  { %v121_v18 = vadd.f32 %v119_v15, %v118_v14  ;;  %128 = vst [vmem:[#allocation10 + $0x8] sm:$0xff] %v126_v16  ;;  %133 = vst [vmem:[#allocation10 + $0x10] sm:$0xff] %v131_v17 }
  0x55   :  { %123 = vst [vmem:[#allocation10] sm:$0xff] %v121_v18 }
  0x56   :  { %260 = shalt.err (!%p257_p8)
}
  0x57   :  { %s261_s15 = scalar_lea.hbm %s404_s4, 384 }
  0x58   :  { %p262_p9 = scmp.ne.s32.totalorder %s404_s4, %s261_s15  ;;  %p265_p10 = scmp.lt.u32.totalorder %s261_s15, %s404_s4 }
  0x5a   :  { %p267_p11 = pnand %p265_p10, %p262_p9 }
  0x5c   :  { %270 = shalt.err (!%p267_p11)
}
  0x5d   :  { %145 = dma.vmem_to_hbm [thread:$0]  %s140_s12, 384, %s404_s4, [#allocation4], %s281_s27, %s281_s27, %s282_s28  }
  0x5e   :  { %277 = dma.done.wait [#allocation4], 384  }
  0x5f   :  { %278 = vsyncadd [#allocation4], 4294966912 }
  0x60   :  { %149 = vsyncpa [#allocation3], 1 }
  0x61   :  { %150 = vsyncpa [#allocation6], 1 }
  0x62   :  { %151 = vsyncpa [#allocation9], 1 }
  0x63   :  { %152 = vsyncpa [#allocation4], 1 }

</bundles_post_ra>
